<compile_context>
chip_gen: v7x
topology: tpu7x:2x2x1
jax: 0.10.0
libtpu: 0.0.40
codegen_flags: <defaults>
</compile_context>

<pallas_src>
import jax
import jax.numpy as jnp
from jax.experimental import pallas as pl
from jax.experimental.pallas import tpu as pltpu


def se_connect_kernel(x_ref, w1_ref, b1_ref, w2_ref, b2_ref, o_ref):
    # x_ref / o_ref block: (b_blk, C, T); weight refs are whole (small) f32 arrays.
    b_blk, _, t = x_ref.shape
    ones_t = jnp.ones((t, 1), dtype=x_ref.dtype)    # time-sum vector (MXU RHS)

    # Small resident weights: load once per grid step, not once per element.
    w1 = w1_ref[...]                                # (H, C) f32, pre-scaled by 1/T
    b1 = b1_ref[...]                                # (H, 1) f32
    w2 = w2_ref[...]                                # (C, H) f32
    b2 = b2_ref[...]                                # (C, 1) f32

    # Static unroll over the batch block: the per-element compute (one MXU
    # time-sum, two tiny f32 GEMVs, one VPU multiply) is small compared with
    # the (C, T) tile's DMA, so it hides under the BlockSpec pipeline.
    for b in range(b_blk):
        xb = x_ref[b]                                               # (C, T), input dtype

        # squeeze: sum over time on the MXU with f32 accumulation.
        # (1/T of the mean is pre-folded into w1 by the wrapper, so the big
        #  tile is never cast to / copied in f32.)
        s = jnp.dot(xb, ones_t, preferred_element_type=jnp.float32)  # (C, 1)

        # excitation MLP in f32:
        #   h = relu((W1/T) @ s + b1),  g = sigmoid(W2 @ h + b2)
        h = jnp.maximum(jnp.dot(w1, s, preferred_element_type=jnp.float32) + b1, 0.0)
        g = jax.nn.sigmoid(jnp.dot(w2, h, preferred_element_type=jnp.float32) + b2)

        # excite: gate (C, 1) broadcast over T lanes, multiplied in the input
        # dtype (no f32 copy of the tile on the store path).
        o_ref[b] = xb * g.astype(o_ref.dtype)


def se_connect(x, w1, b1, w2, b2, *,
               max_block_bytes=8 * 1024 * 1024,    # VMEM cap (4x w/ double buffering)
               min_block_bytes=1 * 1024 * 1024,    # keep DMAs >> per-step overhead
               min_steps=8,                        # pipeline depth / megacore balance
               max_b_blk=32):                      # bounds the static unroll
    """x: (B, C, T); w1: (H, C); b1: (H,); w2: (C, H); b2: (C,)."""
    B, C, T = x.shape
    H = w1.shape[0]

    # Fold the 1/T of the time-mean into linear1's weight (bias unchanged):
    # relu(W1 @ (sum/T) + b1) == relu((W1/T) @ sum + b1).
    w1s = w1.astype(jnp.float32) * (1.0 / T)
    b1c = b1.astype(jnp.float32).reshape(H, 1)
    w2c = w2.astype(jnp.float32)
    b2c = b2.astype(jnp.float32).reshape(C, 1)

    # ---- block sizing -------------------------------------------------------
    # TODO(synk): for very long sequences where a single (C, T) slab exceeds the
    # VMEM budget, add a two-pass T-split (mean pass + gated-write pass).
    per_batch_bytes = C * T * x.dtype.itemsize
    # Largest b_blk whose in+out double-buffering stays within the VMEM budget.
    cap = max(1, max_block_bytes // max(per_batch_bytes, 1))
    # Smallest b_blk keeping each DMA comfortably above the per-step overhead.
    dma_floor = max(1, -(-min_block_bytes // max(per_batch_bytes, 1)))
    # Largest b_blk that still yields >= min_steps grid steps (read/compute/
    # write overlap in the pipeline, and an even split across v7x's 2 cores).
    steps_pref = max(1, -(-B // min_steps))
    b_blk = int(max(1, min(B, max_b_blk, cap, max(dma_floor, steps_pref))))

    grid = (pl.cdiv(B, b_blk),)          # ragged last block: reads padded, writes masked
    block_bytes = b_blk * per_batch_bytes
    # Above the 16/32 MiB scoped defaults (v5e / v6e,v7x); grows only when a
    # single batch slab is larger than the nominal 8 MiB block cap.
    vmem_limit_bytes = int(max(48 * 1024 * 1024,
                               min(4 * block_bytes + (8 << 20), 120 * 1024 * 1024)))

    return pl.pallas_call(
        se_connect_kernel,
        out_shape=jax.ShapeDtypeStruct((B, C, T), x.dtype),
        grid_spec=pltpu.PrefetchScalarGridSpec(
            num_scalar_prefetch=0,
            grid=grid,
            in_specs=[
                pl.BlockSpec((b_blk, C, T), lambda i: (i, 0, 0)),
                pl.BlockSpec((H, C), lambda i: (0, 0)),
                pl.BlockSpec((H, 1), lambda i: (0, 0)),
                pl.BlockSpec((C, H), lambda i: (0, 0)),
                pl.BlockSpec((C, 1), lambda i: (0, 0)),
            ],
            out_specs=pl.BlockSpec((b_blk, C, T), lambda i: (i, 0, 0)),
        ),
        compiler_params=pltpu.CompilerParams(
            dimension_semantics=("parallel",),
            vmem_limit_bytes=vmem_limit_bytes,
        ),
    )(x, w1s, b1c, w2c, b2c)


def se_connect_ref(x, w1, b1, w2, b2):
    """Pure-JAX reference mirroring the PyTorch forward."""
    m = x.mean(axis=2)                                  # (B, C)
    h = jax.nn.relu(m @ w1.T + b1)                      # (B, H)
    g = jax.nn.sigmoid(h @ w2.T + b2)                   # (B, C)
    return x * g[:, :, None]


if __name__ == "__main__":
    key = jax.random.PRNGKey(0)
    s = 2

    # Case 1: tiny shapes consistent with SE_Connect(channels=8, s=2); x is (B, C, T).
    B, C, T = 2, 8, 16
    H = C // s
    kx, kw1, kb1, kw2, kb2 = jax.random.split(key, 5)
    x = jax.random.normal(kx, (B, C, T), dtype=jnp.float32)
    w1 = jax.random.normal(kw1, (H, C), dtype=jnp.float32) * 0.1
    b1 = jax.random.normal(kb1, (H,), dtype=jnp.float32) * 0.1
    w2 = jax.random.normal(kw2, (C, H), dtype=jnp.float32) * 0.1
    b2 = jax.random.normal(kb2, (C,), dtype=jnp.float32) * 0.1

    out = jax.block_until_ready(se_connect(x, w1, b1, w2, b2))
    ref = se_connect_ref(x, w1, b1, w2, b2)
    assert out.shape == (B, C, T)
    assert jnp.allclose(out, ref, atol=1e-5, rtol=1e-5), "mismatch vs reference (small)"

    # Case 2: lane-dense T (full 128-wide vregs), multiple grid steps and a
    # ragged final block (B=6 with b_blk=4 -> 2 grid steps, last block half-valid).
    B2, C2, T2 = 6, 16, 128
    H2 = C2 // s
    k2 = jax.random.split(key, 6)
    x2 = jax.random.normal(k2[0], (B2, C2, T2), dtype=jnp.float32)
    w1b = jax.random.normal(k2[1], (H2, C2), dtype=jnp.float32) * 0.1
    b1b = jax.random.normal(k2[2], (H2,), dtype=jnp.float32) * 0.1
    w2b = jax.random.normal(k2[3], (C2, H2), dtype=jnp.float32) * 0.1
    b2b = jax.random.normal(k2[4], (C2,), dtype=jnp.float32) * 0.1

    out2 = jax.block_until_ready(se_connect(x2, w1b, b1b, w2b, b2b, max_b_blk=4))
    ref2 = se_connect_ref(x2, w1b, b1b, w2b, b2b)
    assert jnp.allclose(out2, ref2, atol=1e-5, rtol=1e-5), "mismatch vs reference (ragged grid)"

    print("KERNEL_OK")
</pallas_src>

<mosaic_0001>
module attributes {stable_mosaic.version = 11 : i64} {
  func.func @se_connect_kernel(%arg0: i32, %arg1: memref<2x8x16xf32, #tpu.memory_space<vmem>>, %arg2: memref<4x8xf32, #tpu.memory_space<vmem>>, %arg3: memref<4x1xf32, #tpu.memory_space<vmem>>, %arg4: memref<8x4xf32, #tpu.memory_space<vmem>>, %arg5: memref<8x1xf32, #tpu.memory_space<vmem>>, %arg6: memref<2x8x16xf32, #tpu.memory_space<vmem>>) attributes {dimension_semantics = [#tpu.dimension_semantics<parallel>], iteration_bounds = array<i64: 1>, scalar_prefetch = 0 : i64, scratch_operands = 0 : i64, tpu.core_type = #tpu.core_type<tc>, window_params = [{transform_indices = @transform_0, window_bounds = array<i64: 2, 8, 16>}, {pipeline_mode = #tpu.pipeline_mode<synchronous>, transform_indices = @transform_1, window_bounds = array<i64: 4, 8>}, {pipeline_mode = #tpu.pipeline_mode<synchronous>, transform_indices = @transform_2, window_bounds = array<i64: 4, 1>}, {pipeline_mode = #tpu.pipeline_mode<synchronous>, transform_indices = @transform_3, window_bounds = array<i64: 8, 4>}, {pipeline_mode = #tpu.pipeline_mode<synchronous>, transform_indices = @transform_4, window_bounds = array<i64: 8, 1>}, {transform_indices = @transform_5, window_bounds = array<i64: 2, 8, 16>}]} {
    %cst = arith.constant 1.000000e+00 : f32
    %0 = vector.broadcast %cst : f32 to vector<16x1xf32>
    %c0 = arith.constant 0 : index
    %c0_0 = arith.constant 0 : index
    %1 = vector.load %arg2[%c0, %c0_0] : memref<4x8xf32, #tpu.memory_space<vmem>>, vector<4x8xf32>
    %c0_1 = arith.constant 0 : index
    %c0_2 = arith.constant 0 : index
    %2 = vector.load %arg3[%c0_1, %c0_2] : memref<4x1xf32, #tpu.memory_space<vmem>>, vector<4x1xf32>
    %c0_3 = arith.constant 0 : index
    %c0_4 = arith.constant 0 : index
    %3 = vector.load %arg4[%c0_3, %c0_4] : memref<8x4xf32, #tpu.memory_space<vmem>>, vector<8x4xf32>
    %c0_5 = arith.constant 0 : index
    %c0_6 = arith.constant 0 : index
    %4 = vector.load %arg5[%c0_5, %c0_6] : memref<8x1xf32, #tpu.memory_space<vmem>>, vector<8x1xf32>
    %c0_7 = arith.constant 0 : index
    %c0_8 = arith.constant 0 : index
    %c0_9 = arith.constant 0 : index
    %5 = vector.load %arg1[%c0_7, %c0_8, %c0_9] : memref<2x8x16xf32, #tpu.memory_space<vmem>>, vector<1x8x16xf32>
    %6 = vector.shape_cast %5 : vector<1x8x16xf32> to vector<8x16xf32>
    %cst_10 = arith.constant dense<0.000000e+00> : vector<8x1xf32>
    %7 = tpu.matmul %6, %0, %cst_10 {dimension_numbers = #tpu.dot_dimension_numbers<[1], [0], [0], [1], [0, 0, 1, 1], [], []>} : vector<8x16xf32>, vector<16x1xf32>, vector<8x1xf32> -> vector<8x1xf32>
    %cst_11 = arith.constant dense<0.000000e+00> : vector<4x1xf32>
    %8 = tpu.matmul %1, %7, %cst_11 {dimension_numbers = #tpu.dot_dimension_numbers<[1], [0], [0], [1], [0, 0, 1, 1], [], []>} : vector<4x8xf32>, vector<8x1xf32>, vector<4x1xf32> -> vector<4x1xf32>
    %9 = arith.addf %8, %2 : vector<4x1xf32>
    %cst_12 = arith.constant 0.000000e+00 : f32
    %10 = vector.broadcast %cst_12 : f32 to vector<4x1xf32>
    %11 = arith.maximumf %9, %10 : vector<4x1xf32>
    %cst_13 = arith.constant dense<0.000000e+00> : vector<8x1xf32>
    %12 = tpu.matmul %3, %11, %cst_13 {dimension_numbers = #tpu.dot_dimension_numbers<[1], [0], [0], [1], [0, 0, 1, 1], [], []>} : vector<8x4xf32>, vector<4x1xf32>, vector<8x1xf32> -> vector<8x1xf32>
    %13 = arith.addf %12, %4 : vector<8x1xf32>
    %14 = arith.negf %13 : vector<8x1xf32>
    %15 = math.exp %14 : vector<8x1xf32>
    %cst_14 = arith.constant 1.000000e+00 : f32
    %16 = vector.broadcast %cst_14 : f32 to vector<8x1xf32>
    %17 = arith.addf %16, %15 : vector<8x1xf32>
    %18 = arith.divf %16, %17 : vector<8x1xf32>
    %19 = vector.broadcast %18 : vector<8x1xf32> to vector<8x16xf32>
    %20 = arith.mulf %6, %19 : vector<8x16xf32>
    %c0_15 = arith.constant 0 : index
    %c0_16 = arith.constant 0 : index
    %c0_17 = arith.constant 0 : index
    %21 = vector.load %arg6[%c0_15, %c0_16, %c0_17] : memref<2x8x16xf32, #tpu.memory_space<vmem>>, vector<1x8x16xf32>
    %22 = vector.shape_cast %21 : vector<1x8x16xf32> to vector<8x16xf32>
    %23 = vector.shape_cast %20 : vector<8x16xf32> to vector<1x8x16xf32>
    tpu.vector_store %arg6[%c0_15, %c0_16, %c0_17], %23 {strides = array<i32>} : memref<2x8x16xf32, #tpu.memory_space<vmem>>, vector<1x8x16xf32>,
    %c1 = arith.constant 1 : index
    %c0_18 = arith.constant 0 : index
    %c0_19 = arith.constant 0 : index
    %24 = vector.load %arg1[%c1, %c0_18, %c0_19] : memref<2x8x16xf32, #tpu.memory_space<vmem>>, vector<1x8x16xf32>
    %25 = vector.shape_cast %24 : vector<1x8x16xf32> to vector<8x16xf32>
    %cst_20 = arith.constant dense<0.000000e+00> : vector<8x1xf32>
    %26 = tpu.matmul %25, %0, %cst_20 {dimension_numbers = #tpu.dot_dimension_numbers<[1], [0], [0], [1], [0, 0, 1, 1], [], []>} : vector<8x16xf32>, vector<16x1xf32>, vector<8x1xf32> -> vector<8x1xf32>
    %cst_21 = arith.constant dense<0.000000e+00> : vector<4x1xf32>
    %27 = tpu.matmul %1, %26, %cst_21 {dimension_numbers = #tpu.dot_dimension_numbers<[1], [0], [0], [1], [0, 0, 1, 1], [], []>} : vector<4x8xf32>, vector<8x1xf32>, vector<4x1xf32> -> vector<4x1xf32>
    %28 = arith.addf %27, %2 : vector<4x1xf32>
    %cst_22 = arith.constant 0.000000e+00 : f32
    %29 = vector.broadcast %cst_22 : f32 to vector<4x1xf32>
    %30 = arith.maximumf %28, %29 : vector<4x1xf32>
    %cst_23 = arith.constant dense<0.000000e+00> : vector<8x1xf32>
    %31 = tpu.matmul %3, %30, %cst_23 {dimension_numbers = #tpu.dot_dimension_numbers<[1], [0], [0], [1], [0, 0, 1, 1], [], []>} : vector<8x4xf32>, vector<4x1xf32>, vector<8x1xf32> -> vector<8x1xf32>
    %32 = arith.addf %31, %4 : vector<8x1xf32>
    %33 = arith.negf %32 : vector<8x1xf32>
    %34 = math.exp %33 : vector<8x1xf32>
    %cst_24 = arith.constant 1.000000e+00 : f32
    %35 = vector.broadcast %cst_24 : f32 to vector<8x1xf32>
    %36 = arith.addf %35, %34 : vector<8x1xf32>
    %37 = arith.divf %35, %36 : vector<8x1xf32>
    %38 = vector.broadcast %37 : vector<8x1xf32> to vector<8x16xf32>
    %39 = arith.mulf %25, %38 : vector<8x16xf32>
    %c1_25 = arith.constant 1 : index
    %c0_26 = arith.constant 0 : index
    %c0_27 = arith.constant 0 : index
    %40 = vector.load %arg6[%c1_25, %c0_26, %c0_27] : memref<2x8x16xf32, #tpu.memory_space<vmem>>, vector<1x8x16xf32>
    %41 = vector.shape_cast %40 : vector<1x8x16xf32> to vector<8x16xf32>
    %42 = vector.shape_cast %39 : vector<8x16xf32> to vector<1x8x16xf32>
    tpu.vector_store %arg6[%c1_25, %c0_26, %c0_27], %42 {strides = array<i32>} : memref<2x8x16xf32, #tpu.memory_space<vmem>>, vector<1x8x16xf32>,
    return
  }
  func.func @transform_0(%arg0: i32) -> (i32, i32, i32) {
    %c0_i32 = arith.constant 0 : i32
    %c0_i32_0 = arith.constant 0 : i32
    %c0_i32_1 = arith.constant 0 : i32
    return %arg0, %c0_i32, %c0_i32_0 : i32, i32, i32
  }
  func.func @transform_1(%arg0: i32) -> (i32, i32) {
    %c0_i32 = arith.constant 0 : i32
    %c0_i32_0 = arith.constant 0 : i32
    %c0_i32_1 = arith.constant 0 : i32
    return %c0_i32, %c0_i32_0 : i32, i32
  }
  func.func @transform_2(%arg0: i32) -> (i32, i32) {
    %c0_i32 = arith.constant 0 : i32
    %c0_i32_0 = arith.constant 0 : i32
    %c0_i32_1 = arith.constant 0 : i32
    return %c0_i32, %c0_i32_0 : i32, i32
  }
  func.func @transform_3(%arg0: i32) -> (i32, i32) {
    %c0_i32 = arith.constant 0 : i32
    %c0_i32_0 = arith.constant 0 : i32
    %c0_i32_1 = arith.constant 0 : i32
    return %c0_i32, %c0_i32_0 : i32, i32
  }
  func.func @transform_4(%arg0: i32) -> (i32, i32) {
    %c0_i32 = arith.constant 0 : i32
    %c0_i32_0 = arith.constant 0 : i32
    %c0_i32_1 = arith.constant 0 : i32
    return %c0_i32, %c0_i32_0 : i32, i32
  }
  func.func @transform_5(%arg0: i32) -> (i32, i32, i32) {
    %c0_i32 = arith.constant 0 : i32
    %c0_i32_0 = arith.constant 0 : i32
    %c0_i32_1 = arith.constant 0 : i32
    return %arg0, %c0_i32, %c0_i32_0 : i32, i32, i32
  }
}

</mosaic_0001>

<bundles_post_ra>
// kernel: tpu_custom_call.1
= control target key start
LH: loop header
LB: loop body
LE: loop exit
PB: predicated region body
PF: predicated region fallthrough
CT: control target
= control target key end

     0   :  { %v619_v0 = vmov 0.0|0.0   ;;  %vm620_vm0 = vmmov 0   ;;  %v621_v1 = vmov 0.0   ;;  %s707_s0 = inlined_call_operand.vmem [shape: f32[2,8,16], index: 0, kind: input, shape index: {}]   ;;  %s708_s1 = inlined_call_operand.vmem [shape: f32[4,8], index: 1, kind: input, shape index: {}]   ;;  %s709_s2 = inlined_call_operand.vmem [shape: f32[4,1], index: 2, kind: input, shape index: {}]   ;;  %s710_s3 = inlined_call_operand.vmem [shape: f32[8,4], index: 3, kind: input, shape index: {}]   ;;  %s711_s4 = inlined_call_operand.vmem [shape: f32[8,1], index: 4, kind: input, shape index: {}]   ;;  %s712_s5 = inlined_call_operand.hbm [shape: f32[2,8,16], index: 5, kind: output, shape index: {}]  }
   0x1   :  { %574 = vmatprep.subr.bf16.mxu0 %v619_v0  ;;  %544 = vmatprep.mubr.msk.f32.mxu0 %vm620_vm0, %v621_v1 }
   0x2   :  { %10 = vsyncpa [#allocation3], 0  ;;  %v622_v2 = vmov 1.0|1.0   ;;  %v25_v3 = vld [vmem:[%s707_s0] sm:$0xff]  ;;  %vm26_vm1 = vcmask 130048   ;;  %547 = vmatprep.subr.mxu1 %v621_v1  ;;  %549 = vmatprep.mubr.msk.f32.mxu1 %vm620_vm0, %v621_v1 }
   0x3   :  { %575 = vmatpush3.bf16.msra.mxu0 %v622_v2  ;;  %v667_v4 = vld [vmem:[%s707_s0 + $0x8] sm:$0xff]  ;;  %v21_v5 = vld [vmem:[%s708_s1] sm:$0xf]  ;;  %vm100_vm2 = vcmask 64512   ;;  %vm179_vm3 = vcmask 1043456   ;;  %vm175_vm4 = vcmask 31744  }
   0x4   :  { %576 = vmatprep.subr.bf16.mxu0 %v619_v0  ;;  %v22_v10 = vld [vmem:[%s709_s2] sm:$0xf]  ;;  %v623_v16 = vmov 0  }
   0x5   :  { %v23_v15 = vld [vmem:[%s710_s3] sm:$0xff]  ;;  %586 = vset.pattern.permute.xlu0 %v623_v16  ;;  %s624_s3 = smov [#allocation2]  }
   0x6   :  { %545 = vmatmul.mubr.msk.f32.vlgmr.msra.gmra.mrb[0].mxu0 %vm26_vm1, %v25_v3  ;;  %v24_v17 = vld [vmem:[%s711_s4] sm:$0xff]  ;;  %s504_s4 = sshll.u32 %s624_s3, 4  ;;  %s505_s4 = int_to_ptr.vmem [resolvable:$true] %s504_s4 }
   0x7   :  { %577 = vmatpush3.bf16.msra.mxu0 %v622_v2  ;;  %561 = vmatprep.mubr.msk.f32.mxu0 %vm620_vm0, %v621_v1  ;;  %s595_s27 = scalar_lea.vmem %s505_s4, 256  ;;  %p600_p1 = scmp.lt.s32.totalorder %s505_s4, %s505_s4 }
   0x8   :  { %569 = vmatprep.subr.mxu0 %v621_v1  ;;  %p596_p0 = scmp.ne.s32.totalorder %s505_s4, %s595_s27  ;;  %p601_p2 = scmp.lt.s32.totalorder %s595_s27, %s595_s27 }
   0xa   :  { %562 = vmatmul.mubr.msk.f32.vlgmr.msra.gmra.mrb[2].mxu0 %vm26_vm1, %v667_v4  ;;  %p602_p3 = por %p601_p2, %p600_p1 }
   0xb   :  { %571 = vmatprep.mubr.msk.f32.mxu0 %vm620_vm0, %v621_v1 }
   0xc   :  { %p603_p4 = pnand %p602_p3, %p596_p0 }
  0xd9   :  { %v96_v6 = vpop.f32.mrb[0].mxu0 }
  0xda   :  { %v546_v7 = vpop.f32.mrb[1].mxu0  ;;  %548 = vmatpush3.msra.mxu1 %v96_v6 }
  0xdb   :  { %550 = vmatmul.mubr.msk.f32.vlgmr.msra.gmra.mrb[0].mxu1 %vm100_vm2, %v21_v5  ;;  %552 = vmatprep.subr.mxu1 %v621_v1 }
  0xdc   :  { %554 = vmatprep.mubr.msk.f32.mxu1 %vm620_vm0, %v621_v1 }
  0xdd   :  { %v337_v8 = vpop.f32.mrb[2].mxu0 }
  0xde   :  { %v563_v9 = vpop.f32.mrb[3].mxu0 }
 0x1ae   :  { %v170_v11 = vpop.f32.mrb[0].mxu1 }
 0x1af   :  { %v171_v12 = vadd.f32 %v170_v11, %v22_v10  ;;  %v551_v13 = vpop.f32.mrb[1].mxu1 }
 0x1b1   :  { %v174_v14 = vmax.f32 %v171_v12, 0.0 }
 0x1b3   :  { %553 = vmatpush3.msk.msra.mxu1 %vm179_vm3, %v174_v14 }
 0x1b4   :  { %555 = vmatmul.mubr.msk.f32.vlgmr.msra.gmra.mrb[2].mxu1 %vm175_vm4, %v23_v15  ;;  %564 = vmatprep.subr.mxu1 %v621_v1 }
 0x1b5   :  { %565 = vmatpush3.msra.mxu1 %v337_v8  ;;  %566 = vmatprep.mubr.msk.f32.mxu1 %vm620_vm0, %v621_v1 }
 0x1b8   :  { %567 = vmatmul.mubr.msk.f32.vlgmr.msra.gmra.mrb[4].mxu1 %vm100_vm2, %v21_v5 }
 0x287   :  { %v249_v18 = vpop.f32.mrb[2].mxu1 }
 0x288   :  { %v250_v19 = vadd.f32 %v249_v18, %v24_v17  ;;  %v556_v20 = vpop.f32.mrb[3].mxu1 }
 0x28a   :  { %v519_v21 = vmul.f32 -1.442695, %v250_v19 }
 0x28b   :  { %v407_v22 = vpop.f32.mrb[4].mxu1 }
 0x28c   :  { %587 = vpow2.f32 %v519_v21  ;;  %v408_v23 = vadd.f32 %v407_v22, %v22_v10  ;;  %v568_v24 = vpop.f32.mrb[5].mxu1 }
 0x28e   :  { %v411_v25 = vmax.f32 %v408_v23, 0.0 }
 0x290   :  { %570 = vmatpush3.msk.msra.mxu0 %vm179_vm3, %v411_v25 }
 0x291   :  { %572 = vmatmul.mubr.msk.f32.vlgmr.msra.gmra.mrb[4].mxu0 %vm175_vm4, %v23_v15 }
 0x296   :  { %v588_v26 = vpop.eup %587 }
 0x297   :  { %v256_v27 = vadd.f32 1.0, %v588_v26 }
 0x299   :  { %589 = vrcp.f32 %v256_v27 }
 0x2a3   :  { %v590_v28 = vpop.eup %589 }
 0x2a4   :  { %261 = vperm.xlu0 %586, %v590_v28  }
 0x323   :  { %v262_v29 = vpop.permute.xlu0 %261 }
 0x324   :  { %v264_v30 = vmul.f32 %v262_v29, %v25_v3 }
 0x326   :  { %265 = vst.msk [vmem:[#allocation2] sm:$0xff] %vm26_vm1, %v264_v30 }
 0x364   :  { %v481_v31 = vpop.f32.mrb[4].mxu0 }
 0x365   :  { %v482_v32 = vadd.f32 %v481_v31, %v24_v17  ;;  %v573_v33 = vpop.f32.mrb[5].mxu0 }
 0x367   :  { %v525_v34 = vmul.f32 -1.442695, %v482_v32 }
 0x369   :  { %591 = vpow2.f32 %v525_v34 }
 0x373   :  { %v592_v35 = vpop.eup %591 }
 0x374   :  { %v488_v36 = vadd.f32 1.0, %v592_v35 }
 0x376   :  { %593 = vrcp.f32 %v488_v36 }
 0x380   :  { %v594_v37 = vpop.eup %593 }
 0x381   :  { %493 = vperm.xlu0 %586, %v594_v37  }
 0x400   :  { %v494_v38 = vpop.permute.xlu0 %493 }
 0x401   :  { %v496_v39 = vmul.f32 %v667_v4, %v494_v38 }
 0x403   :  { %498 = vst.msk [vmem:[#allocation2 + $0x8] sm:$0xff] %vm26_vm1, %v496_v39 }
 0x404   :  { %606 = shalt.err (!%p603_p4)
}
 0x405   :  { %s607_s30 = scalar_lea.hbm %s712_s5, 256 }
 0x406   :  { %p608_p5 = scmp.ne.s32.totalorder %s712_s5, %s607_s30  ;;  %p611_p6 = scmp.lt.u32.totalorder %s607_s30, %s712_s5 }
 0x408   :  { %p613_p7 = pnand %p611_p6, %p608_p5 }
 0x40a   :  { %616 = shalt.err (!%p613_p7)
}
 0x40b   :  { %s625_s10 = smov 128   ;;  %s626_s11 = smov 8  }
 0x40c   :  { %510 = dma.vmem_to_hbm [thread:$0]  %s505_s4, 256, %s712_s5, [#allocation3], %s625_s10, %s625_s10, %s626_s11  }
 0x40d   :  { %617 = dma.done.wait [#allocation3], 256  }
 0x40e   :  { %618 = vsyncadd [#allocation3], 4294967040 }
 0x40f   :  { %514 = vsyncpa [#allocation3], 1 }

</bundles_post_ra>
